<compile_context>
chip_gen: v6e
topology: v6e:2x2x1
jax: 0.10.0
libtpu: 0.0.40
codegen_flags: <defaults>
</compile_context>

<pallas_src>
import jax
import jax.numpy as jnp
from jax.experimental import pallas as pl
from jax.experimental.pallas import tpu as pltpu


def _relu_kernel(x_ref, o_ref):
    # Elementwise ReLU on the real plane only (VPU, memory-bound).
    o_ref[...] = jnp.maximum(x_ref[...], 0.0)


def complex_relu(x: jax.Array, *, block_rows: int = 2048) -> jax.Array:
    """x: complex64 array of any shape (e.g. NCHW). Returns complex64, same shape."""
    orig_shape = x.shape

    re = jnp.real(x)          # float32 plane -> goes through the kernel
    im = jnp.imag(x)          # float32 plane -> pure passthrough, never touches the kernel

    LANE, SUB = 128, 8
    n = re.size
    pad = (-n) % (LANE * SUB)

    re_flat = re.reshape(-1)
    if pad:                   # static Python check: skipped in the common case
        re_flat = jnp.pad(re_flat, (0, pad))
    rows = re_flat.size // LANE
    re2 = re_flat.reshape(rows, LANE)

    # Fixed large tile (multiple of 8 sublanes); cdiv grid masks the boundary block.
    tr = min(block_rows, rows)
    tr = max(SUB, (tr // SUB) * SUB)
    grid = (pl.cdiv(rows, tr),)

    spec = pl.BlockSpec((tr, LANE), lambda i: (i, 0))

    re_out = pl.pallas_call(
        _relu_kernel,
        out_shape=jax.ShapeDtypeStruct((rows, LANE), re2.dtype),
        grid_spec=pltpu.PrefetchScalarGridSpec(
            num_scalar_prefetch=0,
            grid=grid,
            in_specs=[spec],
            out_specs=spec,
        ),
        input_output_aliases={0: 0},   # elementwise: write back into the same HBM slab
        compiler_params=pltpu.CompilerParams(
            dimension_semantics=("parallel",),
        ),
    )(re2)

    re_res = re_out.reshape(-1)
    if pad:
        re_res = re_res[:n]
    re_res = re_res.reshape(orig_shape)

    return jax.lax.complex(re_res, im)


if __name__ == "__main__":
    key = jax.random.PRNGKey(0)
    k_re, k_im = jax.random.split(key)
    shape = (2, 4, 16, 16)  # NCHW, small
    x_re = jax.random.normal(k_re, shape, dtype=jnp.float32)
    x_im = jax.random.normal(k_im, shape, dtype=jnp.float32)
    x = jax.lax.complex(x_re, x_im)  # complex64

    complex_relu_jit = jax.jit(complex_relu)
    y = complex_relu_jit(x)
    y = jax.block_until_ready(y)

    # reference check
    y_ref = jax.lax.complex(jnp.maximum(x_re, 0.0), x_im)
    assert y.shape == x.shape and y.dtype == jnp.complex64
    assert jnp.allclose(jnp.real(y), jnp.real(y_ref)), "real part mismatch"
    assert jnp.allclose(jnp.imag(y), jnp.imag(y_ref)), "imag part mismatch"

    print("KERNEL_OK")
</pallas_src>

<mosaic_0001>
module attributes {stable_mosaic.version = 11 : i64} {
  func.func @_relu_kernel(%arg0: i32, %arg1: memref<16x128xf32, #tpu.memory_space<vmem>>, %arg2: memref<16x128xf32, #tpu.memory_space<vmem>>) attributes {dimension_semantics = [#tpu.dimension_semantics<parallel>], iteration_bounds = array<i64: 1>, scalar_prefetch = 0 : i64, scratch_operands = 0 : i64, tpu.core_type = #tpu.core_type<tc>, window_params = [{transform_indices = @transform_0, window_bounds = array<i64: 16, 128>}, {transform_indices = @transform_1, window_bounds = array<i64: 16, 128>}]} {
    %c0 = arith.constant 0 : index
    %c0_0 = arith.constant 0 : index
    %0 = vector.load %arg1[%c0, %c0_0] : memref<16x128xf32, #tpu.memory_space<vmem>>, vector<16x128xf32>
    %cst = arith.constant 0.000000e+00 : f32
    %1 = vector.broadcast %cst : f32 to vector<16x128xf32>
    %2 = arith.maximumf %0, %1 : vector<16x128xf32>
    %c0_1 = arith.constant 0 : index
    %c0_2 = arith.constant 0 : index
    %3 = vector.load %arg2[%c0_1, %c0_2] : memref<16x128xf32, #tpu.memory_space<vmem>>, vector<16x128xf32>
    tpu.vector_store %arg2[%c0_1, %c0_2], %2 {strides = array<i32>} : memref<16x128xf32, #tpu.memory_space<vmem>>, vector<16x128xf32>,
    return
  }
  func.func @transform_0(%arg0: i32) -> (i32, i32) {
    %c0_i32 = arith.constant 0 : i32
    %c0_i32_0 = arith.constant 0 : i32
    return %arg0, %c0_i32 : i32, i32
  }
  func.func @transform_1(%arg0: i32) -> (i32, i32) {
    %c0_i32 = arith.constant 0 : i32
    %c0_i32_0 = arith.constant 0 : i32
    return %arg0, %c0_i32 : i32, i32
  }
}

</mosaic_0001>

<bundles_post_ra>
// kernel: custom-call.1
= control target key start
LH: loop header
LB: loop body
LE: loop exit
PB: predicated region body
PF: predicated region fallthrough
CT: control target
= control target key end

     0   :  { %s51_s0 = inlined_call_operand.hbm [shape: c64[2,4,16,16], index: 0, kind: input, shape index: {}]   ;;  %s52_s1 = inlined_call_operand.vmem [shape: f32[2,4,16,16], index: 1, kind: output, shape index: {}]  }
   0x1   :  { %s2_s8 = scalar_lea.hbm %s51_s0, 2048 }
   0x2   :  { %3 = vsyncpa [#allocation0], 0  ;;  %s4_s11 = sshll.u32 %s52_s1, 4  ;;  %s5_s11 = int_to_ptr.vmem [resolvable:$true] %s4_s11 }
   0x3   :  { %s20_s12 = scalar_lea.vmem %s5_s11, 2048  ;;  %p25_p1 = scmp.lt.s32.totalorder %s5_s11, %s5_s11 }
   0x4   :  { %p21_p0 = scmp.ne.s32.totalorder %s5_s11, %s20_s12  ;;  %p26_p2 = scmp.lt.s32.totalorder %s20_s12, %s20_s12 }
   0x6   :  { %p27_p3 = por %p26_p2, %p25_p1 }
   0x8   :  { %p28_p4 = pnand %p27_p3, %p21_p0 }
   0xa   :  { %31 = shalt.err (!%p28_p4)  }
   0xb   :  { %7 = dma.hbm_to_vmem [thread:$0]  %s2_s8, 2048, %s5_s11, [#allocation0] }
   0xc   :  { %33 = dma.done.wait [#allocation0], 2048  }
   0xd   :  { %34 = vsyncadd [#allocation0], 4294965248 }
   0xe   :  { %9 = vsyncpa [#allocation0], 1 }

// kernel: custom-call
= control target key start
LH: loop header
LB: loop body
LE: loop exit
PB: predicated region body
PF: predicated region fallthrough
CT: control target
= control target key end

     0   :  { %2 = vsyncpa [#allocation0], 0  ;;  %s47_s0 = inlined_call_operand.hbm [shape: c64[2,4,16,16], index: 0, kind: input, shape index: {}]   ;;  %s48_s1 = inlined_call_operand.vmem [shape: f32[2,4,16,16], index: 1, kind: output, shape index: {}]  }
   0x1   :  { %s3_s8 = sshll.u32 %s48_s1, 4  ;;  %s4_s8 = int_to_ptr.vmem [resolvable:$true] %s3_s8 }
   0x2   :  { %s17_s9 = scalar_lea.vmem %s4_s8, 2048  ;;  %p22_p1 = scmp.lt.s32.totalorder %s4_s8, %s4_s8 }
   0x3   :  { %p18_p0 = scmp.ne.s32.totalorder %s4_s8, %s17_s9  ;;  %p23_p2 = scmp.lt.s32.totalorder %s17_s9, %s17_s9 }
   0x5   :  { %p24_p3 = por %p23_p2, %p22_p1 }
   0x7   :  { %p25_p4 = pnand %p24_p3, %p18_p0 }
   0x9   :  { %28 = shalt.err (!%p25_p4)  }
   0xa   :  { %6 = dma.hbm_to_vmem [thread:$0]  %s47_s0, 2048, %s4_s8, [#allocation0] }
   0xb   :  { %29 = dma.done.wait [#allocation0], 2048  }
   0xc   :  { %30 = vsyncadd [#allocation0], 4294965248 }
   0xd   :  { %8 = vsyncpa [#allocation0], 1 }

// kernel: custom-call.2
= control target key start
LH: loop header
LB: loop body
LE: loop exit
PB: predicated region body
PF: predicated region fallthrough
CT: control target
= control target key end

     0   :  { %s92_s0 = inlined_call_operand.vmem [shape: f32[2,4,16,16], index: 0, kind: input, shape index: {}]   ;;  %s93_s1 = inlined_call_operand.vmem [shape: f32[2,4,16,16], index: 1, kind: input, shape index: {}]   ;;  %s94_s2 = inlined_call_operand.hbm [shape: c64[2,4,16,16], index: 2, kind: output, shape index: {}]  }
   0x1   :  { %s3_s11 = scalar_lea.hbm %s94_s2, 2048 }
   0x2   :  { %4 = vsyncpa [#allocation0], 0  ;;  %s5_s14 = sshll.u32 %s92_s0, 4  ;;  %s6_s14 = int_to_ptr.vmem [resolvable:$true] %s5_s14 }
   0x3   :  { %s18_s15 = scalar_lea.vmem %s6_s14, 2048  ;;  %p23_p1 = scmp.lt.s32.totalorder %s6_s14, %s6_s14 }
   0x4   :  { %p19_p0 = scmp.ne.s32.totalorder %s6_s14, %s18_s15  ;;  %p24_p2 = scmp.lt.s32.totalorder %s18_s15, %s18_s15 }
   0x6   :  { %p25_p3 = por %p24_p2, %p23_p1 }
   0x8   :  { %p26_p4 = pnand %p25_p3, %p19_p0 }
   0xa   :  { %29 = shalt.err (!%p26_p4)  }
   0xb   :  { %8 = dma.vmem_to_hbm [thread:$0]  %s6_s14, 2048, %s94_s2, [#allocation0] }
   0xc   :  { %61 = dma.done.wait [#allocation0], 2048  }
   0xd   :  { %62 = vsyncadd [#allocation0], 4294965248 }
   0xe   :  { %10 = vsyncpa [#allocation0], 1 }
   0xf   :  { %11 = vsyncpa [#allocation1], 0  ;;  %s12_s0 = sshll.u32 %s93_s1, 4  ;;  %s13_s0 = int_to_ptr.vmem [resolvable:$true] %s12_s0 }
  0x10   :  { %s38_s20 = scalar_lea.vmem %s13_s0, 2048  ;;  %p43_p6 = scmp.lt.s32.totalorder %s13_s0, %s13_s0 }
  0x11   :  { %p39_p5 = scmp.ne.s32.totalorder %s13_s0, %s38_s20  ;;  %p44_p7 = scmp.lt.s32.totalorder %s38_s20, %s38_s20 }
  0x13   :  { %p45_p8 = por %p44_p7, %p43_p6 }
  0x15   :  { %p46_p9 = pnand %p45_p8, %p39_p5 }
  0x17   :  { %49 = shalt.err (!%p46_p9)  }
  0x18   :  { %15 = dma.vmem_to_hbm [thread:$0]  %s13_s0, 2048, %s3_s11, [#allocation1] }
  0x19   :  { %63 = dma.done.wait [#allocation1], 2048  }
  0x1a   :  { %64 = vsyncadd [#allocation1], 4294965248 }
  0x1b   :  { %17 = vsyncpa [#allocation1], 1 }

// kernel: complex_relu.1
= control target key start
LH: loop header
LB: loop body
LE: loop exit
PB: predicated region body
PF: predicated region fallthrough
CT: control target
= control target key end

     0   :  { %s40_s0 = inlined_call_operand.vmem [shape: f32[16,128], index: 0, kind: input, shape index: {}, may-alias: {0,1}]   ;;  %s41_s1 = inlined_call_operand.vmem [shape: f32[16,128], index: 1, kind: output, shape index: {}, may-alias: {0,1}]  }
   0x1   :  { %v8_v0 = vld [vmem:[%s40_s0] sm:$0xff]  ;;  %v9_v1 = vld [vmem:[%s40_s0 + $0x8] sm:$0xff] }
   0x2   :  { %v10_v2 = vmax.f32 %v8_v0, 0.0  ;;  %v11_v3 = vmax.f32 %v9_v1, 0.0 }
   0x4   :  { %12 = vst [vmem:[%s41_s1] sm:$0xff] %v10_v2  ;;  %13 = vst [vmem:[%s41_s1 + $0x8] sm:$0xff] %v11_v3 }

</bundles_post_ra>
